<compile_context>
chip_gen: v7x
topology: tpu7x:2x2x1
jax: 0.10.0
libtpu: 0.0.40
codegen_flags: <defaults>
</compile_context>

<pallas_src>
import functools

import jax
import jax.numpy as jnp
from jax.experimental import pallas as pl
from jax.experimental.pallas import tpu as pltpu


def _attn_kernel(l_ref, g_ref, w_ref,
                 c_ref, acc_out_ref, m_out_ref, d_out_ref,
                 m_scr, d_scr, acc_scr,
                 *, normalize_attn, s_tile, s_total, tiles_per_split):
    # l_ref, g_ref : (1, C, S_TILE)  channels on sublanes, spatial on lanes
    # w_ref        : (C, 1)          conv3d 1x1x1 weight (per-channel scale)
    # c_ref        : (1, 1, S_TILE)  lane-dense logits tile (written every step)
    # acc_out_ref  : (1, C, 1)       per-(n, split) partial weighted sum (written at last s)
    # m_out_ref    : (1, 1, 1)       per-(n, split) partial softmax max
    # d_out_ref    : (1, 1, 1)       per-(n, split) partial softmax denominator
    # m_scr, d_scr : (1, 1) f32      running softmax max / denominator
    # acc_scr      : (C, 1) f32      running weighted-sum accumulator
    s_idx = pl.program_id(2)
    n_s = pl.num_programs(2)

    @pl.when(s_idx == 0)
    def _init():
        m_scr[...] = jnp.full_like(m_scr, -jnp.inf)
        d_scr[...] = jnp.zeros_like(d_scr)
        acc_scr[...] = jnp.zeros_like(acc_scr)

    l = l_ref[0].astype(jnp.float32)        # (C, S_TILE)
    gf = g_ref[0].astype(jnp.float32)       # (C, S_TILE)
    w = w_ref[...].astype(jnp.float32)      # (C, 1)

    x = l + gf                                            # VPU
    # 1x1x1 conv, out_channels=1, no bias: per-channel scale, reduce over C (sublanes).
    c = jnp.sum(x * w, axis=0, keepdims=True)             # (1, S_TILE)   VPU + XLU
    c_ref[0] = c.astype(c_ref.dtype)                      # lane-dense store of raw logits

    # Ragged tail: when S is not a multiple of S_TILE, padded lanes of the last tile
    # hold unspecified data -> mask them out of every reduction.
    needs_mask = (s_total % s_tile) != 0
    if needs_mask:
        global_tile = pl.program_id(1) * tiles_per_split + s_idx
        valid = s_total - global_tile * s_tile
        lane = jax.lax.broadcasted_iota(jnp.int32, (1, s_tile), 1)
        mask = lane < valid
    else:
        mask = None

    if normalize_attn:
        # Online softmax over the tiled S axis.
        c_m = jnp.where(mask, c, -jnp.inf) if mask is not None else c
        m_old = m_scr[...]                                            # (1, 1)
        m_new = jnp.maximum(m_old, jnp.max(c_m, axis=1, keepdims=True))
        alpha = jnp.exp(m_old - m_new)                                # 0 on the first tile
        p = jnp.exp(c_m - m_new)                                      # (1, S_TILE)  EUP
        d_scr[...] = alpha * d_scr[...] + jnp.sum(p, axis=1, keepdims=True)
        contrib = l * p
        if mask is not None:
            contrib = jnp.where(mask, contrib, 0.0)
        acc_scr[...] = alpha * acc_scr[...] + jnp.sum(contrib, axis=1, keepdims=True)
        m_scr[...] = m_new
    else:
        a = jax.nn.sigmoid(c)                                         # (1, S_TILE)
        contrib = l * a
        if mask is not None:
            contrib = jnp.where(mask, contrib, 0.0)
        acc_scr[...] = acc_scr[...] + jnp.sum(contrib, axis=1, keepdims=True)

    @pl.when(s_idx == n_s - 1)
    def _finalize():
        acc_out_ref[0] = acc_scr[...].astype(acc_out_ref.dtype)
        m_out_ref[0] = m_scr[...].astype(m_out_ref.dtype)
        d_out_ref[0] = d_scr[...].astype(d_out_ref.dtype)


def _vmem_capacity_bytes():
    """Per-TensorCore VMEM capacity; conservative fallback = 64 MiB (v7x)."""
    default = 64 * 1024 * 1024
    try:
        info_fn = getattr(pltpu, "get_tpu_info", None)
        if info_fn is None:
            return default
        cap = getattr(info_fn(), "vmem_capacity_bytes", None)
        return int(cap) if cap else default
    except Exception:
        return default


def _plan(S, C, in_itemsize, c_itemsize, n_batch, s_tile=None):
    """Pick (s_tile, num_s, n_splits, vmem_limit_bytes).

    Generation-aware VMEM budgeting: input-tile budget ~0.55x capacity, vmem_limit
    ~0.75x.  Tiles are 128-multiples (tail masked in-kernel) or the full S axis —
    never an over-budget full-S fallback.  For odd N (incl. N==1) the S range is
    split in two so both v7x TensorCores get work.
    """
    cap = _vmem_capacity_bytes()
    budget = min(int(0.55 * cap), 96 * 1024 * 1024)
    vmem_limit = min(int(0.75 * cap), 120 * 1024 * 1024)

    if s_tile is None:
        # Per-lane VMEM bytes: 2 inputs x 2 pipeline buffers x C rows + c-out double buffer.
        per_lane = 2 * 2 * C * in_itemsize + 2 * c_itemsize
        max_tile = max(128, (budget // per_lane) // 128 * 128)
        s_tile = S if S <= max_tile else max_tile
    elif s_tile < S and s_tile % 128 != 0:
        s_tile = ((s_tile + 127) // 128) * 128

    num_s = -(-S // s_tile)                  # cdiv

    n_splits = 1
    if n_batch % 2 == 1 and S > 128:
        st, ns = s_tile, num_s
        while ns % 2 != 0:                   # need an even tile count to split evenly
            new_tile = max(128, ((-(-S // (ns + 1)) + 127) // 128) * 128)
            if new_tile >= st:
                break
            st, ns = new_tile, -(-S // new_tile)
        if ns % 2 == 0:
            s_tile, num_s, n_splits = st, ns, 2

    return s_tile, num_s, n_splits, vmem_limit


def linear_attention_block_3d(l, g, weight, *, normalize_attn=True, s_tile=None):
    """l, g: (N, C, T, H, W); weight: (1, C, 1, 1, 1) (Conv3d 1x1x1, no bias).

    Accepts f32 or bf16 inputs (bf16 halves HBM traffic); math is f32 in-kernel.
    Returns (c, g_out) with c: (N, 1, T, H, W), g_out: (N, C), both in l.dtype.
    """
    N, C, T, H, W = l.shape
    S = T * H * W

    # Free reshapes only — no host-side transpose / extra HBM pass.
    l3 = l.reshape(N, C, S)
    g3 = g.reshape(N, C, S)
    w_c1 = weight.reshape(C, 1)

    in_itemsize = jnp.dtype(l.dtype).itemsize
    s_tile, num_s, n_splits, vmem_limit = _plan(S, C, in_itemsize, in_itemsize, N, s_tile)
    nsps = num_s // n_splits

    # TODO(synk): tile the channel axis too if C is so large that a single (C, 128)
    # input block already overflows the VMEM budget.
    kernel = functools.partial(_attn_kernel, normalize_attn=normalize_attn,
                               s_tile=s_tile, s_total=S, tiles_per_split=nsps)

    flops = 5 * N * S * C
    transcendentals = N * S
    bytes_accessed = (in_itemsize * (2 * N * S * C + N * S + C)
                      + 4 * N * n_splits * (C + 2))

    c_flat, acc_p, m_p, d_p = pl.pallas_call(
        kernel,
        out_shape=(
            jax.ShapeDtypeStruct((N, 1, S), l.dtype),                     # raw logits
            jax.ShapeDtypeStruct((N * n_splits, C, 1), jnp.float32),      # partial acc
            jax.ShapeDtypeStruct((N * n_splits, 1, 1), jnp.float32),      # partial max
            jax.ShapeDtypeStruct((N * n_splits, 1, 1), jnp.float32),      # partial denom
        ),
        grid_spec=pltpu.PrefetchScalarGridSpec(
            num_scalar_prefetch=0,
            grid=(N, n_splits, nsps),
            in_specs=[
                pl.BlockSpec((1, C, s_tile), lambda n, sp, s: (n, 0, sp * nsps + s)),
                pl.BlockSpec((1, C, s_tile), lambda n, sp, s: (n, 0, sp * nsps + s)),
                pl.BlockSpec((C, 1), lambda n, sp, s: (0, 0)),   # constant index -> loaded once
            ],
            out_specs=[
                pl.BlockSpec((1, 1, s_tile), lambda n, sp, s: (n, 0, sp * nsps + s)),
                pl.BlockSpec((1, C, 1), lambda n, sp, s: (n * n_splits + sp, 0, 0)),
                pl.BlockSpec((1, 1, 1), lambda n, sp, s: (n * n_splits + sp, 0, 0)),
                pl.BlockSpec((1, 1, 1), lambda n, sp, s: (n * n_splits + sp, 0, 0)),
            ],
            scratch_shapes=[
                pltpu.VMEM((1, 1), jnp.float32),   # running max
                pltpu.VMEM((1, 1), jnp.float32),   # running denom
                pltpu.VMEM((C, 1), jnp.float32),   # running weighted accumulator
            ],
        ),
        compiler_params=pltpu.CompilerParams(
            dimension_semantics=("parallel", "parallel", "arbitrary"),
            vmem_limit_bytes=vmem_limit,
        ),
        cost_estimate=pl.CostEstimate(
            flops=flops, transcendentals=transcendentals, bytes_accessed=bytes_accessed),
    )(l3, g3, w_c1)

    # Tiny combine across splits in plain JAX (log-sum-exp merge), all in f32.
    acc = acc_p.reshape(N, n_splits, C)
    if normalize_attn:
        m = m_p.reshape(N, n_splits)
        d = d_p.reshape(N, n_splits)
        m_tot = jnp.max(m, axis=1, keepdims=True)             # (N, 1)
        scale = jnp.exp(m - m_tot)                             # (N, n_splits)
        d_tot = jnp.sum(d * scale, axis=1)                     # (N,)
        g_out = jnp.sum(acc * scale[:, :, None], axis=1) / d_tot[:, None]
    else:
        g_out = jnp.sum(acc, axis=1) / float(S)

    c_out = c_flat.reshape(N, 1, T, H, W)
    return c_out, g_out.astype(l.dtype)


def _reference(l, g, weight, *, normalize_attn=True):
    """Pure-JAX reference mirroring the PyTorch forward."""
    N, C, T, H, W = l.shape
    w = weight.reshape(1, C)
    x = l + g
    c = jnp.einsum('nctHW,oc->notHW', x, w)               # (N, 1, T, H, W)
    if normalize_attn:
        a = jax.nn.softmax(c.reshape(N, 1, -1), axis=2).reshape(N, 1, T, H, W)
        gout = (a * l).reshape(N, C, -1).sum(axis=2)
    else:
        a = jax.nn.sigmoid(c)
        gout = (a * l).reshape(N, C, -1).mean(axis=2)
    return c, gout


if __name__ == "__main__":
    master_key = jax.random.PRNGKey(0)

    def _run_case(N, C, T, H, W, dtype, normalize_attn, s_tile, atol, rtol, key):
        k_l, k_g, k_w = jax.random.split(key, 3)
        l = jax.random.normal(k_l, (N, C, T, H, W), dtype=jnp.float32).astype(dtype)
        g = jax.random.normal(k_g, (N, C, T, H, W), dtype=jnp.float32).astype(dtype)
        weight = (jax.random.normal(k_w, (1, C, 1, 1, 1), dtype=jnp.float32) * 0.5).astype(dtype)

        c_out, g_out = linear_attention_block_3d(
            l, g, weight, normalize_attn=normalize_attn, s_tile=s_tile)
        jax.block_until_ready((c_out, g_out))

        c_exp, g_exp = _reference(l.astype(jnp.float32), g.astype(jnp.float32),
                                  weight.astype(jnp.float32),
                                  normalize_attn=normalize_attn)
        assert c_out.shape == (N, 1, T, H, W) and g_out.shape == (N, C)
        assert jnp.allclose(c_out.astype(jnp.float32), c_exp, atol=atol, rtol=rtol)
        assert jnp.allclose(g_out.astype(jnp.float32), g_exp, atol=atol, rtol=rtol)

    keys = jax.random.split(master_key, 6)
    # Basic small shape, single full-S tile, f32, both attention modes.
    _run_case(2, 4, 4, 4, 4, jnp.float32, True, None, 1e-5, 1e-5, keys[0])
    _run_case(2, 4, 4, 4, 4, jnp.float32, False, None, 1e-5, 1e-5, keys[1])
    # Multi-tile online softmax (forced 128-wide tiles), bf16 inputs (halved HBM traffic).
    _run_case(2, 16, 4, 8, 8, jnp.bfloat16, True, 128, 1e-1, 5e-2, keys[2])
    _run_case(2, 16, 4, 8, 8, jnp.bfloat16, False, 128, 1e-1, 5e-2, keys[3])
    # Odd batch (N=1): dual-TensorCore S-split + ragged-tail masking (S = 210).
    _run_case(1, 8, 5, 6, 7, jnp.float32, True, None, 1e-5, 1e-5, keys[4])
    _run_case(1, 8, 5, 6, 7, jnp.float32, False, None, 1e-5, 1e-5, keys[5])

    print("KERNEL_OK")
</pallas_src>

<mosaic_0001>
module attributes {stable_mosaic.version = 11 : i64} {
  func.func @_attn_kernel(%arg0: i32, %arg1: i32, %arg2: i32, %arg3: memref<1x4x64xf32, #tpu.memory_space<vmem>>, %arg4: memref<1x4x64xf32, #tpu.memory_space<vmem>>, %arg5: memref<4x1xf32, #tpu.memory_space<vmem>>, %arg6: memref<1x1x64xf32, #tpu.memory_space<vmem>>, %arg7: memref<1x4x1xf32, #tpu.memory_space<vmem>>, %arg8: memref<1x1x1xf32, #tpu.memory_space<vmem>>, %arg9: memref<1x1x1xf32, #tpu.memory_space<vmem>>, %arg10: memref<1x1xf32, #tpu.memory_space<vmem>>, %arg11: memref<1x1xf32, #tpu.memory_space<vmem>>, %arg12: memref<4x1xf32, #tpu.memory_space<vmem>>) attributes {dimension_semantics = [#tpu.dimension_semantics<parallel>, #tpu.dimension_semantics<parallel>, #tpu.dimension_semantics<arbitrary>], iteration_bounds = array<i64: 2, 1, 1>, scalar_prefetch = 0 : i64, scratch_operands = 3 : i64, tpu.core_type = #tpu.core_type<tc>, window_params = [{transform_indices = @transform_0, window_bounds = array<i64: 1, 4, 64>}, {transform_indices = @transform_1, window_bounds = array<i64: 1, 4, 64>}, {pipeline_mode = #tpu.pipeline_mode<synchronous>, transform_indices = @transform_2, window_bounds = array<i64: 4, 1>}, {transform_indices = @transform_3, window_bounds = array<i64: 1, 1, 64>}, {transform_indices = @transform_4, window_bounds = array<i64: 1, 4, 1>}, {transform_indices = @transform_5, window_bounds = array<i64: 1, 1, 1>}, {transform_indices = @transform_6, window_bounds = array<i64: 1, 1, 1>}]} {
    %c0_i32 = arith.constant 0 : i32
    %0 = arith.cmpi eq, %arg2, %c0_i32 : i32
    %1 = arith.extui %0 : i1 to i32
    %c0_i32_0 = arith.constant 0 : i32
    %2 = arith.cmpi ne, %1, %c0_i32_0 : i32
    scf.if %2 {
      %cst_28 = arith.constant 0xFF800000 : f32
      %44 = vector.broadcast %cst_28 : f32 to vector<1x1xf32>
      %c0_29 = arith.constant 0 : index
      %c0_30 = arith.constant 0 : index
      %45 = vector.load %arg10[%c0_29, %c0_30] : memref<1x1xf32, #tpu.memory_space<vmem>>, vector<1x1xf32>
      tpu.vector_store %arg10[%c0_29, %c0_30], %44 {strides = array<i32>} : memref<1x1xf32, #tpu.memory_space<vmem>>, vector<1x1xf32>,
      %cst_31 = arith.constant 0.000000e+00 : f32
      %46 = vector.broadcast %cst_31 : f32 to vector<1x1xf32>
      %c0_32 = arith.constant 0 : index
      %c0_33 = arith.constant 0 : index
      %47 = vector.load %arg11[%c0_32, %c0_33] : memref<1x1xf32, #tpu.memory_space<vmem>>, vector<1x1xf32>
      tpu.vector_store %arg11[%c0_32, %c0_33], %46 {strides = array<i32>} : memref<1x1xf32, #tpu.memory_space<vmem>>, vector<1x1xf32>,
      %cst_34 = arith.constant 0.000000e+00 : f32
      %48 = vector.broadcast %cst_34 : f32 to vector<4x1xf32>
      %c0_35 = arith.constant 0 : index
      %c0_36 = arith.constant 0 : index
      %49 = vector.load %arg12[%c0_35, %c0_36] : memref<4x1xf32, #tpu.memory_space<vmem>>, vector<4x1xf32>
      tpu.vector_store %arg12[%c0_35, %c0_36], %48 {strides = array<i32>} : memref<4x1xf32, #tpu.memory_space<vmem>>, vector<4x1xf32>,
    } else {
    }
    %c0 = arith.constant 0 : index
    %c0_1 = arith.constant 0 : index
    %c0_2 = arith.constant 0 : index
    %3 = vector.load %arg3[%c0, %c0_1, %c0_2] : memref<1x4x64xf32, #tpu.memory_space<vmem>>, vector<1x4x64xf32>
    %4 = vector.shape_cast %3 : vector<1x4x64xf32> to vector<4x64xf32>
    %c0_3 = arith.constant 0 : index
    %c0_4 = arith.constant 0 : index
    %c0_5 = arith.constant 0 : index
    %5 = vector.load %arg4[%c0_3, %c0_4, %c0_5] : memref<1x4x64xf32, #tpu.memory_space<vmem>>, vector<1x4x64xf32>
    %6 = vector.shape_cast %5 : vector<1x4x64xf32> to vector<4x64xf32>
    %c0_6 = arith.constant 0 : index
    %c0_7 = arith.constant 0 : index
    %7 = vector.load %arg5[%c0_6, %c0_7] : memref<4x1xf32, #tpu.memory_space<vmem>>, vector<4x1xf32>
    %8 = arith.addf %4, %6 : vector<4x64xf32>
    %9 = vector.broadcast %7 : vector<4x1xf32> to vector<4x64xf32>
    %10 = arith.mulf %8, %9 : vector<4x64xf32>
    %cst = arith.constant dense<0.000000e+00> : vector<64xf32>
    %11 = vector.multi_reduction <add>, %10, %cst [0] : vector<4x64xf32> to vector<64xf32>
    %12 = vector.shape_cast %11 : vector<64xf32> to vector<1x64xf32>
    %c0_8 = arith.constant 0 : index
    %c0_9 = arith.constant 0 : index
    %c0_10 = arith.constant 0 : index
    %13 = vector.load %arg6[%c0_8, %c0_9, %c0_10] : memref<1x1x64xf32, #tpu.memory_space<vmem>>, vector<1x1x64xf32>
    %14 = vector.shape_cast %13 : vector<1x1x64xf32> to vector<1x64xf32>
    %15 = vector.shape_cast %12 : vector<1x64xf32> to vector<1x1x64xf32>
    tpu.vector_store %arg6[%c0_8, %c0_9, %c0_10], %15 {strides = array<i32>} : memref<1x1x64xf32, #tpu.memory_space<vmem>>, vector<1x1x64xf32>,
    %c0_11 = arith.constant 0 : index
    %c0_12 = arith.constant 0 : index
    %16 = vector.load %arg10[%c0_11, %c0_12] : memref<1x1xf32, #tpu.memory_space<vmem>>, vector<1x1xf32>
    %cst_13 = arith.constant dense<0xFF800000> : vector<1xf32>
    %17 = vector.multi_reduction <maximumf>, %12, %cst_13 [1] : vector<1x64xf32> to vector<1xf32>
    %18 = vector.shape_cast %17 : vector<1xf32> to vector<1x1xf32>
    %19 = arith.maximumf %16, %18 : vector<1x1xf32>
    %20 = arith.subf %16, %19 : vector<1x1xf32>
    %21 = math.exp %20 : vector<1x1xf32>
    %22 = vector.broadcast %19 : vector<1x1xf32> to vector<1x64xf32>
    %23 = arith.subf %12, %22 : vector<1x64xf32>
    %24 = math.exp %23 : vector<1x64xf32>
    %c0_14 = arith.constant 0 : index
    %c0_15 = arith.constant 0 : index
    %25 = vector.load %arg11[%c0_14, %c0_15] : memref<1x1xf32, #tpu.memory_space<vmem>>, vector<1x1xf32>
    %26 = arith.mulf %21, %25 : vector<1x1xf32>
    %cst_16 = arith.constant dense<0.000000e+00> : vector<1xf32>
    %27 = vector.multi_reduction <add>, %24, %cst_16 [1] : vector<1x64xf32> to vector<1xf32>
    %28 = vector.shape_cast %27 : vector<1xf32> to vector<1x1xf32>
    %29 = arith.addf %26, %28 : vector<1x1xf32>
    %c0_17 = arith.constant 0 : index
    %c0_18 = arith.constant 0 : index
    %30 = vector.load %arg11[%c0_17, %c0_18] : memref<1x1xf32, #tpu.memory_space<vmem>>, vector<1x1xf32>
    tpu.vector_store %arg11[%c0_17, %c0_18], %29 {strides = array<i32>} : memref<1x1xf32, #tpu.memory_space<vmem>>, vector<1x1xf32>,
    %31 = vector.broadcast %24 : vector<1x64xf32> to vector<4x64xf32>
    %32 = arith.mulf %4, %31 : vector<4x64xf32>
    %c0_19 = arith.constant 0 : index
    %c0_20 = arith.constant 0 : index
    %33 = vector.load %arg12[%c0_19, %c0_20] : memref<4x1xf32, #tpu.memory_space<vmem>>, vector<4x1xf32>
    %34 = vector.broadcast %21 : vector<1x1xf32> to vector<4x1xf32>
    %35 = arith.mulf %34, %33 : vector<4x1xf32>
    %cst_21 = arith.constant dense<0.000000e+00> : vector<4xf32>
    %36 = vector.multi_reduction <add>, %32, %cst_21 [1] : vector<4x64xf32> to vector<4xf32>
    %37 = vector.shape_cast %36 : vector<4xf32> to vector<4x1xf32>
    %38 = arith.addf %35, %37 : vector<4x1xf32>
    %c0_22 = arith.constant 0 : index
    %c0_23 = arith.constant 0 : index
    %39 = vector.load %arg12[%c0_22, %c0_23] : memref<4x1xf32, #tpu.memory_space<vmem>>, vector<4x1xf32>
    tpu.vector_store %arg12[%c0_22, %c0_23], %38 {strides = array<i32>} : memref<4x1xf32, #tpu.memory_space<vmem>>, vector<4x1xf32>,
    %c0_24 = arith.constant 0 : index
    %c0_25 = arith.constant 0 : index
    %40 = vector.load %arg10[%c0_24, %c0_25] : memref<1x1xf32, #tpu.memory_space<vmem>>, vector<1x1xf32>
    tpu.vector_store %arg10[%c0_24, %c0_25], %19 {strides = array<i32>} : memref<1x1xf32, #tpu.memory_space<vmem>>, vector<1x1xf32>,
    %c0_i32_26 = arith.constant 0 : i32
    %41 = arith.cmpi eq, %arg2, %c0_i32_26 : i32
    %42 = arith.extui %41 : i1 to i32
    %c0_i32_27 = arith.constant 0 : i32
    %43 = arith.cmpi ne, %42, %c0_i32_27 : i32
    scf.if %43 {
      %c0_28 = arith.constant 0 : index
      %c0_29 = arith.constant 0 : index
      %44 = vector.load %arg12[%c0_28, %c0_29] : memref<4x1xf32, #tpu.memory_space<vmem>>, vector<4x1xf32>
      %c0_30 = arith.constant 0 : index
      %c0_31 = arith.constant 0 : index
      %c0_32 = arith.constant 0 : index
      %45 = vector.load %arg7[%c0_30, %c0_31, %c0_32] : memref<1x4x1xf32, #tpu.memory_space<vmem>>, vector<1x4x1xf32>
      %46 = vector.shape_cast %45 : vector<1x4x1xf32> to vector<4x1xf32>
      %47 = vector.shape_cast %44 : vector<4x1xf32> to vector<1x4x1xf32>
      tpu.vector_store %arg7[%c0_30, %c0_31, %c0_32], %47 {strides = array<i32>} : memref<1x4x1xf32, #tpu.memory_space<vmem>>, vector<1x4x1xf32>,
      %c0_33 = arith.constant 0 : index
      %c0_34 = arith.constant 0 : index
      %48 = vector.load %arg10[%c0_33, %c0_34] : memref<1x1xf32, #tpu.memory_space<vmem>>, vector<1x1xf32>
      %c0_35 = arith.constant 0 : index
      %c0_36 = arith.constant 0 : index
      %c0_37 = arith.constant 0 : index
      %49 = vector.load %arg8[%c0_35, %c0_36, %c0_37] : memref<1x1x1xf32, #tpu.memory_space<vmem>>, vector<1x1x1xf32>
      %50 = vector.shape_cast %49 : vector<1x1x1xf32> to vector<1x1xf32>
      %51 = vector.shape_cast %48 : vector<1x1xf32> to vector<1x1x1xf32>
      tpu.vector_store %arg8[%c0_35, %c0_36, %c0_37], %51 {strides = array<i32>} : memref<1x1x1xf32, #tpu.memory_space<vmem>>, vector<1x1x1xf32>,
      %c0_38 = arith.constant 0 : index
      %c0_39 = arith.constant 0 : index
      %52 = vector.load %arg11[%c0_38, %c0_39] : memref<1x1xf32, #tpu.memory_space<vmem>>, vector<1x1xf32>
      %c0_40 = arith.constant 0 : index
      %c0_41 = arith.constant 0 : index
      %c0_42 = arith.constant 0 : index
      %53 = vector.load %arg9[%c0_40, %c0_41, %c0_42] : memref<1x1x1xf32, #tpu.memory_space<vmem>>, vector<1x1x1xf32>
      %54 = vector.shape_cast %53 : vector<1x1x1xf32> to vector<1x1xf32>
      %55 = vector.shape_cast %52 : vector<1x1xf32> to vector<1x1x1xf32>
      tpu.vector_store %arg9[%c0_40, %c0_41, %c0_42], %55 {strides = array<i32>} : memref<1x1x1xf32, #tpu.memory_space<vmem>>, vector<1x1x1xf32>,
    } else {
    }
    return
  }
  func.func @transform_0(%arg0: i32, %arg1: i32, %arg2: i32) -> (i32, i32, i32) {
    %c1_i32 = arith.constant 1 : i32
    %0 = arith.muli %arg1, %c1_i32 : i32
    %1 = arith.addi %0, %arg2 : i32
    %c0_i32 = arith.constant 0 : i32
    %c0_i32_0 = arith.constant 0 : i32
    return %arg0, %c0_i32, %1 : i32, i32, i32
  }
  func.func @transform_1(%arg0: i32, %arg1: i32, %arg2: i32) -> (i32, i32, i32) {
    %c1_i32 = arith.constant 1 : i32
    %0 = arith.muli %arg1, %c1_i32 : i32
    %1 = arith.addi %0, %arg2 : i32
    %c0_i32 = arith.constant 0 : i32
    %c0_i32_0 = arith.constant 0 : i32
    return %arg0, %c0_i32, %1 : i32, i32, i32
  }
  func.func @transform_2(%arg0: i32, %arg1: i32, %arg2: i32) -> (i32, i32) {
    %c0_i32 = arith.constant 0 : i32
    %c0_i32_0 = arith.constant 0 : i32
    %c0_i32_1 = arith.constant 0 : i32
    return %c0_i32, %c0_i32_0 : i32, i32
  }
  func.func @transform_3(%arg0: i32, %arg1: i32, %arg2: i32) -> (i32, i32, i32) {
    %c1_i32 = arith.constant 1 : i32
    %0 = arith.muli %arg1, %c1_i32 : i32
    %1 = arith.addi %0, %arg2 : i32
    %c0_i32 = arith.constant 0 : i32
    %c0_i32_0 = arith.constant 0 : i32
    return %arg0, %c0_i32, %1 : i32, i32, i32
  }
  func.func @transform_4(%arg0: i32, %arg1: i32, %arg2: i32) -> (i32, i32, i32) {
    %c1_i32 = arith.constant 1 : i32
    %0 = arith.muli %arg0, %c1_i32 : i32
    %1 = arith.addi %0, %arg1 : i32
    %c0_i32 = arith.constant 0 : i32
    %c0_i32_0 = arith.constant 0 : i32
    %c0_i32_1 = arith.constant 0 : i32
    return %1, %c0_i32, %c0_i32_0 : i32, i32, i32
  }
  func.func @transform_5(%arg0: i32, %arg1: i32, %arg2: i32) -> (i32, i32, i32) {
    %c1_i32 = arith.constant 1 : i32
    %0 = arith.muli %arg0, %c1_i32 : i32
    %1 = arith.addi %0, %arg1 : i32
    %c0_i32 = arith.constant 0 : i32
    %c0_i32_0 = arith.constant 0 : i32
    %c0_i32_1 = arith.constant 0 : i32
    return %1, %c0_i32, %c0_i32_0 : i32, i32, i32
  }
  func.func @transform_6(%arg0: i32, %arg1: i32, %arg2: i32) -> (i32, i32, i32) {
    %c1_i32 = arith.constant 1 : i32
    %0 = arith.muli %arg0, %c1_i32 : i32
    %1 = arith.addi %0, %arg1 : i32
    %c0_i32 = arith.constant 0 : i32
    %c0_i32_0 = arith.constant 0 : i32
    %c0_i32_1 = arith.constant 0 : i32
    return %1, %c0_i32, %c0_i32_0 : i32, i32, i32
  }
}

</mosaic_0001>

<bundles_post_ra>
// kernel: tpu_custom_call.1
= control target key start
LH: loop header
LB: loop body
LE: loop exit
PB: predicated region body
PF: predicated region fallthrough
CT: control target
= control target key end

     0   :  { %12 = vsyncpa [#allocation6], 0  ;;  %s1106_s0 = inlined_call_operand.hbm [shape: f32[2,4,64], index: 0, kind: input, shape index: {}]   ;;  %s1107_s1 = inlined_call_operand.vmem [shape: f32[2,4,64], index: 1, kind: input, shape index: {}]   ;;  %s1108_s2 = inlined_call_operand.vmem [shape: f32[4,1], index: 2, kind: input, shape index: {}]   ;;  %s1109_s3 = inlined_call_operand.hbm [shape: f32[2,1,64], index: 3, kind: output, shape index: {0}]   ;;  %s1110_s4 = inlined_call_operand.vmem [shape: f32[2,4,1], index: 4, kind: output, shape index: {1}]   ;;  %s1111_s5 = inlined_call_operand.vmem [shape: f32[2,1,1], index: 5, kind: output, shape index: {2}]   ;;  %s1112_s6 = inlined_call_operand.vmem [shape: f32[2,1,1], index: 6, kind: output, shape index: {3}]  }
   0x1   :  { %14 = vsyncpa [#allocation6 + $0x1], 0 }
   0x2   :  { %15 = vsyncpa [#allocation7], 0 }
   0x3   :  { %17 = vsyncpa [#allocation7 + $0x1], 0  ;;  %s896_s21 = smov 0   ;;  %s898_s22 = smov 0  }
   0x4   :  { %s900_s23 = smov 0   ;;  %s902_s24 = smov 0  }
   0x5   :  { %s904_s25 = smov 0   ;;  %s906_s26 = smov 0  }
   0x6 LB: > { %s658_s27 = sadd.s32 4294967295, %s854_s26   ;;  %s659_s28 = sadd.s32 4294967294, %s854_s26   ;;  %s854_s26 = sphi %s906_s26, %s23_s26   ;;  %s850_s25 = sphi %s904_s25, %s1128_s25   ;;  %s846_s24 = sphi %s902_s24, %s1127_s24   ;;  %s842_s23 = sphi %s900_s23, %s1126_s23   ;;  %s838_s22 = sphi %s898_s22, %s1125_s22   ;;  %s834_s21 = sphi %s896_s21, %s1124_s21  }
   0x7   : > { %s42_s29 = sadd.s32 1, %s850_s25  ;;  %s53_s30 = sadd.s32 1, %s842_s23 }
   0x8   : > { %p44_p0 = scmp.ge.s32.totalorder %s42_s29, 2  ;;  %p60_p1 = scmp.ne.s32.totalorder %s842_s23, %s838_s22 }
   0x9   : > { %p61_p2 = scmp.eq.s32.totalorder %s854_s26, 0  ;;  %p66_p3 = scmp.ne.s32.totalorder %s838_s22, %s834_s21 }
   0xa   : > { %s1130_s29 = smov (%p44_p0, %s42_s29), 0  ;;  %p67_p5 = scmp.eq.s32.totalorder %s658_s27, 0 }
   0xb   : > { %p937_p4 = por %p61_p2, %p60_p1  ;;  %s48_s8 = ssub.s32 %s850_s25, %s1130_s29 }
   0xc   : > { %p145_p6 = scmp.eq.s32.totalorder %s658_s27, 1  ;;  %p51_p7 = scmp.eq.s32.totalorder %s48_s8, 0 }
   0xd   : > { %p943_p8 = por %p67_p5, %p66_p3  ;;  %p151_p10 = scmp.eq.s32.totalorder %s659_s28, 1 }
   0xe   : > { %p947_p9 = por %p145_p6, %p60_p1  ;;  %p683_p13 = scmp.lt.s32.totalorder %s854_s26, 2 }
   0xf   : > { %s952_s11 = scalar_select %p51_p7, %s842_s23, %s53_s30  }
  0x10   : > { %s1116_s10 = scalar_select %p947_p9, 1, 0 }
  0x11   : > { %p954_p11 = por %p151_p10, %p66_p3  ;;  %s258_s13 = sand.u32 1, %s842_s23  }
  0x12   : > { %s662_s14 = sshll.u32 %s258_s13, 2  ;;  %s663_s15 = sshll.u32 %s850_s25, 6 }
  0x13   : > { %s1117_s12 = scalar_select %p954_p11, 1, 0 }
  0x14   : > { %s965_s18 = scalar_lea.hbm %s1106_s0, %s663_s15  ;;  %s262_s19 = scalar_lea.vmem [#allocation5], %s662_s14 }
  0x15   : > { %s271_s20 = sshll.u32 %s262_s19, 4  ;;  %p971_p0 = pnand %p683_p13, %p937_p4  ;;  %s967_s20 = int_to_ptr.vmem [resolvable:$true] %s271_s20 }
  0x16   : > { %s259_s28 = scalar_lea.sflag [#allocation6], %s258_s13  ;;  %s742_s30 = scalar_lea.hbm %s965_s18, 64 }
  0x17   : > { %p743_p3 = scmp.ne.s32.totalorder %s965_s18, %s742_s30  ;;  %p744_p5 = pneg %p971_p0 }
  0x18   : > { %s747_s7 = scalar_lea.hbm %s1106_s0, 128  ;;  %p748_p4 = scmp.lt.u32.totalorder %s965_s18, %s1106_s0 }
  0x19   : > { %p745_p6 = pnand %p744_p5, %p743_p3  ;;  %p749_p10 = scmp.lt.u32.totalorder %s747_s7, %s742_s30 }
  0x1a   : > { %p751_p12 = scmp.lt.u32.totalorder %s742_s30, %s965_s18 }
  0x1b   : > { %p746_p7 = pneg %p745_p6  ;;  %p750_p13 = por %p749_p10, %p748_p4 }
  0x1d   : > { %p752_p1 = por %p751_p12, %p750_p13 }
  0x1f   : > { %p753_p2 = pnand %p752_p1, %p746_p7 }
  0x21   : > { %756 = shalt.err (!%p753_p2)
}
  0x22   : > { %s757_s13 = scalar_lea.vmem %s967_s20, 64  ;;  %s856_s17 = smov [#allocation5]  }
  0x23   : > { %p758_p3 = scmp.ne.s32.totalorder %s967_s20, %s757_s13  ;;  %s762_s19 = sshll.u32 %s856_s17, 4  ;;  %s763_s19 = int_to_ptr.vmem [resolvable:$false] %s762_s19 }
  0x24   : > { %s764_s8 = scalar_lea.vmem %s763_s19, 128  ;;  %p765_p9 = scmp.lt.s32.totalorder %s967_s20, %s763_s19 }
  0x25   : > { %p760_p6 = pnand %p758_p3, %p744_p5  ;;  %p766_p4 = scmp.lt.s32.totalorder %s764_s8, %s757_s13 }
  0x27   : > { %p761_p11 = pneg %p760_p6  ;;  %p767_p10 = por %p766_p4, %p765_p9 }
  0x29   : > { %p768_p12 = pnand %p767_p10, %p761_p11 }
  0x2b   : > { %771 = shalt.err (!%p768_p12)
}
  0x2c   : > { %678 = dma.hbm_to_vmem [thread:$0]  (!%p971_p0), %s965_s18, 64, %s967_s20, %s259_s28  }
  0x2d   : > { %p1119_p1 = scmp.lt.s32.totalorder %s854_s26, 3  ;;  %p1120_p2 = scmp.ge.s32.totalorder %s854_s26, 1 }
  0x2f   : > { %p289_p5 = pnand %p1120_p2, %p1119_p1 }
  0x30   : > { %s1007_s30 = sand.u32 (!%p289_p5), 1, %s838_s22  }
  0x31   : > { %292 = sbr.rel (%p289_p5) target bundleno = 648 (0x288), region = 32  ;;  %s665_s14 = sshll.u32 (!%p289_p5), %s1007_s30, 2 }
  0x32   : > { %s295_s7 = scalar_lea.sflag (!%p289_p5), [#allocation6], %s1007_s30  ;;  %s298_s15 = scalar_lea.vmem (!%p289_p5), [#allocation5], %s665_s14 }
  0x38   : > { %825 = dma.done.wait (%p943_p8), %s295_s7, 64  }
  0x39   : > { %827 = vsyncadd (%p943_p8), %s295_s7, 4294967232  ;;  %v857_v0 = vmov 0   ;;  %v385_v1 = vld [vmem:[%s1108_s2] sm:$0xf]  ;;  %vm378_vm0 = vcmask 0   ;;  %v858_v2 = vmov -inf   ;;  %v417_v22 = vlaneseq }
  0x3a   : > { %736 = vset.pattern.permute.xlu0 %v857_v0  ;;  %737 = vset.pattern.permute.xlu1 %v857_v0  ;;  %379 = vst.msk [vmem:[#allocation2] sm:$0x1] %vm378_vm0, %v858_v2  ;;  %p349_p9 = scmp.lt.s32.totalorder %s846_s24, 1  ;;  %v383_v3 = vld [vmem:[%s298_s15] sm:$0xf]  ;;  %vm393_vm1 = vcmask 519168  }
  0x3b   : > { %389 = vperm.xlu0 %736, %v385_v1   ;;  %vm404_vm2 = vcmask 523264   ;;  %vm401_vm3 = vcmask 516096   ;;  %s327_s17 = scalar_lea.vmem [#allocation8], %s1007_s30  ;;  %v859_v16 = vmov 0.0   ;;  %vm381_vm4 = vcmask 3072   ;;  %s668_s7 = sshll.u32 %s846_s24, 4 }
  0x3c   : > { %s1021_s27 = scalar_select %p349_p9, %s846_s24, 1  ;;  %380 = vst.msk [vmem:[#allocation3] sm:$0x1] %vm378_vm0, %v859_v16  ;;  %v418_v23 = vshrl.u32 %v417_v22, 7 }
  0x3d   : > { %382 = vst.msk [vmem:[#allocation4] sm:$0xf] %vm381_vm4, %v859_v16  ;;  %s485_s15 = sshll.u32 %s327_s17, 4  ;;  %s1050_s28 = scalar_lea.hbm %s1109_s3, %s668_s7  ;;  %s486_s15 = int_to_ptr.vmem [resolvable:$true] %s485_s15 }
  0x3e   : > { %s666_s9 = sshll.u32 %s1021_s27, 2  ;;  %s367_s14 = scalar_lea.vmem %s1111_s5, %s1021_s27  ;;  %v419_v24 = vsub.s32 0, %v418_v23 }
  0x3f   : > { %s355_s13 = scalar_lea.vmem %s1107_s1, %s666_s9  ;;  %s458_s16 = scalar_lea.sflag [#allocation7], %s1007_s30 }
  0x40   : > { %v384_v4 = vld [vmem:[%s355_s13] sm:$0xf]  ;;  %s772_s13 = scalar_lea.vmem %s486_s15, 16  ;;  %p1121_p11 = scmp.ne.s32.totalorder %s1116_s10, 0 }
  0x41   : > { %v386_v5 = vadd.f32 %v384_v4, %v383_v3  ;;  %v403_v17 = vld [vmem:[#allocation2] sm:$0x1]  ;;  %p773_p8 = scmp.ne.s32.totalorder %s486_s15, %s772_s13  ;;  %s860_s19 = smov [#allocation8]  }
  0x42   : > { %s776_s8 = sshll.u32 %s860_s19, 4  ;;  %s777_s8 = int_to_ptr.vmem [resolvable:$false] %s776_s8 }
  0x43   : > { %p774_p0 = pnand %p773_p8, %p1121_p11  ;;  %p779_p13 = scmp.lt.s32.totalorder %s486_s15, %s777_s8 }
  0x45   : > { %p775_p7 = pneg %p774_p0 }
  0xba   : > { %v390_v6 = vpop.permute.xlu0 %389 }
  0xbb   : > { %v392_v7 = vmul.f32 %v390_v6, %v386_v5 }
  0xbd   : > { %v394_v8 = vsel %vm393_vm1, %v392_v7, 0.0 }
  0xbe   : > { %v395_v9 = vrot.slane %v394_v8, 4 }
  0xc0   : > { %v396_v10 = vadd.f32 %v395_v9, %v394_v8 }
  0xc2   : > { %v397_v11 = vrot.slane %v396_v10, 2 }
  0xc4   : > { %v398_v12 = vadd.f32 %v397_v11, %v396_v10 }
  0xc6   : > { %v399_v13 = vrot.slane %v398_v12, 1 }
  0xc8   : > { %v400_v14 = vadd.f32 %v399_v13, %v398_v12 }
  0xca   : > { %v405_v15 = vsel %vm404_vm2, %v400_v14, -inf  ;;  %402 = vst.msk [vmem:[%s327_s17] sm:$0x1] %vm401_vm3, %v400_v14 }
  0xcb   : > { %406 = vmax.xlane.f32.xlu0 %v405_v15 }
 0x158   : > { %v407_v18 = vpop.xlane.xlu0 %406 }
 0x159   : > { %v408_v19 = vmax.f32 %v403_v17, %v407_v18 }
 0x15b   : > { %v409_v20 = vsub.f32 %v403_v17, %v408_v19  ;;  %447 = vst.msk [vmem:[#allocation2] sm:$0x1] %vm378_vm0, %v408_v19  ;;  %414 = vperm.xlu1 %737, %v408_v19  }
 0x162   : > { %v453_v21 = vld [vmem:[#allocation2] sm:$0x1] }
 0x163   : > { %454 = vst.msk [vmem:[%s367_s14] sm:$0x1] %vm378_vm0, %v453_v21  ;;  %s778_s14 = scalar_lea.vmem %s777_s8, 32 }
 0x164   : > { %p780_p3 = scmp.lt.s32.totalorder %s778_s14, %s772_s13 }
 0x166   : > { %p781_p6 = por %p780_p3, %p779_p13 }
 0x168   : > { %p782_p4 = pnand %p781_p6, %p775_p7 }
 0x1da   : > { %v415_v25 = vpop.permute.xlu1 %414 }
 0x1db   : > { %v420_v26 = vrot.slane %v415_v25, %v419_v24 }
 0x1dd   : > { %v421_v27 = vsub.f32 %v400_v14, %v420_v26 }
 0x1df   : > { %v422_v28 = vmul.f32 1.442695, %v421_v27 }
 0x1e1   : > { %738 = vpow2.f32 %v422_v28 }
 0x1eb   : > { %v739_v29 = vpop.eup %738 }
 0x1ec   : > { %v426_v30 = vsel %vm404_vm2, %v739_v29, 0.0  ;;  %v432_v31 = vmul.f32 %v739_v29, %v383_v3 }
 0x1ed   : > { %427 = vadd.xlane.f32.xlu1 %v426_v30 }
 0x1ee   : > { %v441_v32 = vsel %vm393_vm1, %v432_v31, 0.0 }
 0x1ef   : > { %442 = vadd.xlane.f32.xlu0 %v441_v32 }
 0x1f0   : > { %785 = shalt.err (!%p782_p4)
}
 0x1f1   : > { %s786_s24 = scalar_lea.hbm %s1050_s28, 16  ;;  %s790_s7 = scalar_lea.hbm %s1109_s3, 32 }
 0x1f2   : > { %p787_p10 = scmp.ne.s32.totalorder %s1050_s28, %s786_s24  ;;  %p791_p2 = scmp.lt.u32.totalorder %s1050_s28, %s1109_s3 }
 0x1f3   : > { %p792_p5 = scmp.lt.u32.totalorder %s790_s7, %s786_s24  ;;  %p794_p8 = scmp.lt.u32.totalorder %s786_s24, %s1050_s28 }
 0x1f4   : > { %p788_p12 = pnand %p787_p10, %p1121_p11 }
 0x1f5   : > { %p793_p9 = por %p792_p5, %p791_p2 }
 0x1f6   : > { %p789_p1 = pneg %p788_p12 }
 0x1f7   : > { %p795_p0 = por %p794_p8, %p793_p9 }
 0x1f9   : > { %p796_p7 = pnand %p795_p0, %p789_p1 }
 0x1fb   : > { %799 = shalt.err (!%p796_p7)
}
 0x1fc   : > { %673 = dma.vmem_to_hbm [thread:$0]  (%p1121_p11), %s486_s15, 16, %s1050_s28, %s458_s16   ;;  %v410_v33 = vmul.f32 1.442695, %v409_v20  ;;  %v424_v35 = vld [vmem:[#allocation3] sm:$0x1] }
 0x1fd   : > { %v433_v37 = vld [vmem:[#allocation4] sm:$0xf]  ;;  %s372_s15 = scalar_lea.vmem %s1112_s6, %s1021_s27  ;;  %s362_s19 = scalar_lea.vmem %s1110_s4, %s666_s9 }
 0x1fe   : > { %740 = vpow2.f32 %v410_v33 }
 0x208   : > { %v741_v34 = vpop.eup %740 }
 0x209   : > { %v438_v36 = vrot.slane %v741_v34, %v419_v24  ;;  %v425_v38 = vmul.f32 %v741_v34, %v424_v35 }
 0x20b   : > { %v440_v41 = vmul.f32 %v438_v36, %v433_v37 }
 0x27a   : > { %v428_v39 = vpop.xlane.xlu1 %427 }
 0x27b   : > { %v429_v40 = vadd.f32 %v428_v39, %v425_v38 }
 0x27c   : > { %v443_v42 = vpop.xlane.xlu0 %442 }
 0x27d   : > { %431 = vst.msk [vmem:[#allocation3] sm:$0x1] %vm378_vm0, %v429_v40  ;;  %v444_v43 = vadd.f32 %v443_v42, %v440_v41 }
 0x27f   : > { %446 = vst.msk [vmem:[#allocation4] sm:$0xf] %vm381_vm4, %v444_v43 }
 0x284   : > { %v455_v44 = vld [vmem:[#allocation3] sm:$0x1] }
 0x285   : > { %456 = vst.msk [vmem:[%s372_s15] sm:$0x1] %vm378_vm0, %v455_v44 }
 0x286   : > { %v451_v45 = vld [vmem:[#allocation4] sm:$0xf] }
 0x287   : > { %452 = vst.msk [vmem:[%s362_s19] sm:$0xf] %vm381_vm4, %v451_v45 }
 0x288 PF: > { %s509_s8 = sand.u32 1, %s834_s21   ;;  %p1122_p11 = scmp.ne.s32.totalorder %s1117_s12, 0 }
 0x289   : > { %p1123_p13 = scmp.ge.s32.totalorder %s854_s26, 2  ;;  %s510_s14 = scalar_lea.sflag [#allocation7], %s509_s8 }
 0x28b   : > { %p680_p3 = pnand %p1123_p13, %p1122_p11 }
 0x28d   : > { %829 = dma.done.wait (!%p680_p3), %s510_s14, 16  }
 0x28e   : > { %831 = vsyncadd (!%p680_p3), %s510_s14, 4294967280  ;;  %s23_s26 = sadd.s32 1, %s854_s26   ;;  %s1124_s21 = smov %s838_s22 }
 0x28f   : > { %p20_p6 = scmp.ge.s32.totalorder %s23_s26, 4   ;;  %s1125_s22 = smov %s842_s23 }
 0x290   : > { %s1126_s23 = smov %s952_s11  ;;  %s1127_s24 = smov %s850_s25 }
 0x291   : > { %s1128_s25 = smov %s1130_s29  ;;  %22 = sbr.rel (!%p20_p6) target bundleno = 6 (0x6), region = 124 }
 0x298   :  { %536 = vsyncpa [#allocation6], 1 }
 0x299   :  { %538 = vsyncpa [#allocation6 + $0x1], 1 }
 0x29a   :  { %539 = vsyncpa [#allocation7], 1 }
 0x29b   :  { %541 = vsyncpa [#allocation7 + $0x1], 1 }

</bundles_post_ra>
